<compile_context>
chip_gen: v7x
topology: tpu7x:2x2x1
jax: 0.10.0
libtpu: 0.0.40
codegen_flags: <defaults>
</compile_context>

<pallas_src>
import math

import jax
import jax.numpy as jnp
from jax import lax
from jax.experimental import pallas as pl
from jax.experimental.pallas import tpu as pltpu


def _round_up(a: int, b: int) -> int:
    return -(-a // b) * b


def _make_kernel(half_dim: int, scale: float, split_store: bool):
    def kernel(x_ref, out_ref):
        # x_ref:   (TB, 1)   float32
        # out_ref: (TB, dim) out_dtype, dim = 2 * half_dim
        x = x_ref[...]                                            # (TB, 1)
        # Frequency table built in-kernel: O(half_dim) iota+exp, no DMA.
        pos = lax.broadcasted_iota(jnp.int32, (1, half_dim), 1)   # (1, H)
        freqs = jnp.exp(pos.astype(jnp.float32) * (-scale))       # (1, H)
        arg = x * freqs                                           # (TB, H) f32

        # TODO(synk): a shared-range-reduction sincos (one Cody-Waite
        # reduction, two short polynomials + quadrant selects) would cut VALU
        # work ~30-50% (matters on v7x where HBM BW raises the roofline), but
        # needs a careful f32 reduction for args up to ~1e3 rad; keep
        # jnp.sin/jnp.cos until a bundle dump shows the VALU slot saturating.
        s = jnp.sin(arg)
        c = jnp.cos(arg)

        if split_store:
            # half_dim % 128 == 0: two lane-aligned full-width stores, no
            # concatenated (TB, dim) temporary.
            out_ref[:, :half_dim] = s.astype(out_ref.dtype)
            out_ref[:, half_dim:] = c.astype(out_ref.dtype)
        else:
            out_ref[...] = jnp.concatenate([s, c], axis=-1).astype(out_ref.dtype)

    return kernel


def sinusoidal_pos_emb(x, dim, *, out_dtype=jnp.float32):
    """x: (B,) array of timesteps. Returns (B, dim) sinusoidal embedding."""
    assert dim % 2 == 0 and dim >= 4, "dim must be even and >= 4"
    x = jnp.asarray(x, jnp.float32)
    B = int(x.shape[0])
    half_dim = dim // 2
    scale = math.log(10000.0) / (half_dim - 1)

    out_dtype = jnp.dtype(out_dtype)
    out_bytes = out_dtype.itemsize
    # Sublane multiple: 8 for 32-bit, 16 for 16-bit packed output tiles.
    sub = 8 if out_bytes == 4 else 16

    # ---- byte-budgeted batch tile -------------------------------------
    # Target ~2 MiB per output block (>=85% of HBM roofline in the tile
    # sweep), floor of 512 rows for small dim, capped so double-buffered
    # buffers (out + lane-padded (tb,128) f32 input) fit a 12 MiB budget
    # that is safe on v5e's 16 MiB default scoped VMEM and v7x's 64 MiB.
    target_out_block = 2 << 20
    vmem_budget = 12 << 20
    per_row_bytes = 2 * dim * out_bytes + 2 * 128 * 4
    tb = max(512, target_out_block // (dim * out_bytes))
    tb = min(tb, vmem_budget // per_row_bytes)
    tb = min(tb, _round_up(B, sub))            # never bigger than padded B
    if B > sub:
        # Keep >= 2 grid steps so the "parallel" axis shards across both
        # TensorCores on v7x (no-op on 1-TC v5e/v6e).
        tb = min(tb, _round_up(-(-B // 2), sub))
    tb = max(sub, (tb // sub) * sub)
    n_blocks = pl.cdiv(B, tb)

    x2 = x.reshape(B, 1)

    cost = pl.CostEstimate(
        flops=int(B * dim * 5 + half_dim * 2),
        transcendentals=int(B * dim + half_dim),
        bytes_accessed=int(B * dim * out_bytes + B * 4),
    )

    # Ragged last block (B % tb != 0) is handled by Pallas: padded tail rows
    # are computed on padded input and their stores discarded — no wrapper
    # pad / slice pass over the output.
    out = pl.pallas_call(
        _make_kernel(half_dim, scale, split_store=(half_dim % 128 == 0)),
        out_shape=jax.ShapeDtypeStruct((B, dim), out_dtype),
        grid=(n_blocks,),
        in_specs=[pl.BlockSpec((tb, 1), lambda i: (i, 0))],
        out_specs=pl.BlockSpec((tb, dim), lambda i: (i, 0)),
        compiler_params=pltpu.CompilerParams(
            dimension_semantics=("parallel",),
            vmem_limit_bytes=32 * 1024 * 1024,
        ),
        cost_estimate=cost,
    )(x2)
    return out


def _reference(x, dim):
    half_dim = dim // 2
    scale = math.log(10000.0) / (half_dim - 1)
    freqs = jnp.exp(jnp.arange(half_dim, dtype=jnp.float32) * -scale)
    emb = x[:, None].astype(jnp.float32) * freqs[None, :]
    return jnp.concatenate([jnp.sin(emb), jnp.cos(emb)], axis=-1)


if __name__ == "__main__":
    key = jax.random.PRNGKey(0)
    k1, k2, k3, k4 = jax.random.split(key, 4)

    # Args reach ~1e3 rad (diffusion timesteps up to 1000 * freq up to 1), so
    # f32 sin/cos implementation differences (Mosaic vs XLA) can reach ~1e-4;
    # use a tolerance that still validates the math tightly on [-1, 1] values.
    ATOL = 2e-3

    # 1) Small main case.
    B, dim = 8, 32
    x = jax.random.uniform(k1, (B,), minval=0.0, maxval=1000.0,
                           dtype=jnp.float32)
    out = jax.block_until_ready(sinusoidal_pos_emb(x, dim))
    ref = _reference(x, dim)
    assert out.shape == (B, dim) and out.dtype == jnp.float32, (out.shape, out.dtype)
    assert jnp.allclose(out, ref, atol=ATOL, rtol=0.0), float(
        jnp.max(jnp.abs(out - ref)))

    # 2) Ragged batch (exercises the maskless wrapper: no pad / no out[:B]).
    B2 = 37
    x2 = jax.random.uniform(k2, (B2,), minval=0.0, maxval=1000.0,
                            dtype=jnp.float32)
    out2 = jax.block_until_ready(sinusoidal_pos_emb(x2, dim))
    ref2 = _reference(x2, dim)
    assert out2.shape == (B2, dim), out2.shape
    assert jnp.allclose(out2, ref2, atol=ATOL, rtol=0.0), float(
        jnp.max(jnp.abs(out2 - ref2)))

    # 3) Lane-aligned halves (split-store path) with >= 2 grid blocks.
    B3, dim3 = 64, 256
    x3 = jax.random.uniform(k3, (B3,), minval=0.0, maxval=1000.0,
                            dtype=jnp.float32)
    out3 = jax.block_until_ready(sinusoidal_pos_emb(x3, dim3))
    ref3 = _reference(x3, dim3)
    assert out3.shape == (B3, dim3), out3.shape
    assert jnp.allclose(out3, ref3, atol=ATOL, rtol=0.0), float(
        jnp.max(jnp.abs(out3 - ref3)))

    # 4) Optional bf16 writeback (halves HBM write bytes; only if downstream
    #    accepts bf16 — default stays f32 to match the PyTorch module).
    B4, dim4 = 48, 64
    x4 = jax.random.uniform(k4, (B4,), minval=0.0, maxval=1000.0,
                            dtype=jnp.float32)
    out4 = jax.block_until_ready(
        sinusoidal_pos_emb(x4, dim4, out_dtype=jnp.bfloat16))
    ref4 = _reference(x4, dim4)
    assert out4.shape == (B4, dim4) and out4.dtype == jnp.bfloat16
    assert jnp.allclose(out4.astype(jnp.float32), ref4, atol=1e-2, rtol=1e-2), \
        float(jnp.max(jnp.abs(out4.astype(jnp.float32) - ref4)))

    print("KERNEL_OK")
</pallas_src>

<mosaic_0001>
module attributes {stable_mosaic.version = 11 : i64} {
  func.func @kernel(%arg0: i32, %arg1: memref<8x1xf32, #tpu.memory_space<vmem>>, %arg2: memref<8x32xf32, #tpu.memory_space<vmem>>) attributes {dimension_semantics = [#tpu.dimension_semantics<parallel>], iteration_bounds = array<i64: 1>, scalar_prefetch = 0 : i64, scratch_operands = 0 : i64, tpu.core_type = #tpu.core_type<tc>, window_params = [{transform_indices = @transform_0, window_bounds = array<i64: 8, 1>}, {transform_indices = @transform_1, window_bounds = array<i64: 8, 32>}]} {
    %c0 = arith.constant 0 : index
    %c0_0 = arith.constant 0 : index
    %0 = vector.load %arg1[%c0, %c0_0] : memref<8x1xf32, #tpu.memory_space<vmem>>, vector<8x1xf32>
    %1 = tpu.iota {dimensions = array<i32: 1>} : vector<1x16xi32>
    %2 = arith.sitofp %1 : vector<1x16xi32> to vector<1x16xf32>
    %cst = arith.constant -0.614022672 : f32
    %3 = vector.broadcast %cst : f32 to vector<1x16xf32>
    %4 = arith.mulf %2, %3 : vector<1x16xf32>
    %5 = math.exp %4 : vector<1x16xf32>
    %6 = vector.broadcast %0 : vector<8x1xf32> to vector<8x16xf32>
    %7 = vector.broadcast %5 : vector<1x16xf32> to vector<8x16xf32>
    %8 = arith.mulf %6, %7 : vector<8x16xf32>
    %9 = math.sin %8 : vector<8x16xf32>
    %10 = math.cos %8 : vector<8x16xf32>
    %11 = tpu.concatenate %9, %10 in 1 : vector<8x16xf32>, vector<8x16xf32> -> vector<8x32xf32>
    %c0_1 = arith.constant 0 : index
    %c0_2 = arith.constant 0 : index
    %12 = vector.load %arg2[%c0_1, %c0_2] : memref<8x32xf32, #tpu.memory_space<vmem>>, vector<8x32xf32>
    tpu.vector_store %arg2[%c0_1, %c0_2], %11 {strides = array<i32>} : memref<8x32xf32, #tpu.memory_space<vmem>>, vector<8x32xf32>,
    return
  }
  func.func @transform_0(%arg0: i32) -> (i32, i32) {
    %c0_i32 = arith.constant 0 : i32
    %c0_i32_0 = arith.constant 0 : i32
    return %arg0, %c0_i32 : i32, i32
  }
  func.func @transform_1(%arg0: i32) -> (i32, i32) {
    %c0_i32 = arith.constant 0 : i32
    %c0_i32_0 = arith.constant 0 : i32
    return %arg0, %c0_i32 : i32, i32
  }
}

</mosaic_0001>

<bundles_post_ra>
// kernel: tpu_custom_call.1
= control target key start
LH: loop header
LB: loop body
LE: loop exit
PB: predicated region body
PF: predicated region fallthrough
CT: control target
= control target key end

     0   :  { %v303_v1 = vmov 0   ;;  %s358_s0 = inlined_call_operand.vmem [shape: f32[8,1], index: 0, kind: input, shape index: {}]   ;;  %s359_s1 = inlined_call_operand.hbm [shape: f32[8,32], index: 1, kind: output, shape index: {}]  }
   0x1   :  { %v9_v0 = vld [vmem:[%s358_s0] sm:$0xff]  ;;  %272 = vset.pattern.permute.xlu0 %v303_v1 }
   0x2   :  { %18 = vperm.xlu0 %272, %v9_v0  }
   0x3   :  { %6 = vsyncpa [#allocation3], 0  ;;  %v10_v2 = vlaneseq  ;;  %v304_v20 = vmov 683565275   ;;  %v305_v22 = vmov 2475754826  }
   0x4   :  { %v306_v25 = vmov 2131351028   ;;  %v307_v28 = vmov 2102212464   ;;  %v308_v31 = vmov 920167782  }
   0x5   :  { %v11_v3 = vand.u32 127, %v10_v2  ;;  %v309_v34 = vmov 1326507024   ;;  %s310_s0 = smov 16   ;;  %s311_s8 = smov [#allocation2]  }
   0x6   :  { %s243_s9 = sshll.u32 %s311_s8, 4  ;;  %s244_s9 = int_to_ptr.vmem [resolvable:$true] %s243_s9 }
   0x7   :  { %v12_v4 = vcvt.s32.f32 %v11_v3  ;;  %s279_s10 = scalar_lea.vmem %s244_s9, 128  ;;  %p284_p1 = scmp.lt.s32.totalorder %s244_s9, %s244_s9 }
   0x8   :  { %p280_p0 = scmp.ne.s32.totalorder %s244_s9, %s279_s10  ;;  %p285_p2 = scmp.lt.s32.totalorder %s279_s10, %s279_s10 }
   0x9   :  { %v13_v5 = vmul.f32 -0.6140227, %v12_v4 }
   0xa   :  { %p286_p3 = por %p285_p2, %p284_p1 }
   0xb   :  { %v14_v6 = vmul.f32 1.442695, %v13_v5 }
   0xc   :  { %p287_p4 = pnand %p286_p3, %p280_p0 }
   0xd   :  { %273 = vpow2.f32 %v14_v6 }
  0x17   :  { %v274_v7 = vpop.eup %273 }
  0x81   :  { %v19_v8 = vpop.permute.xlu0 %18 }
  0x82   :  { %v325_v9 = vmul.f32 %v274_v7, %v19_v8 }
  0x84   :  { %v25_v10 = vand.u32 2139095040, %v325_v9  ;;  %v22_v14 = vand.u32 2147483647, %v325_v9  ;;  %vm24_vm7 = vcmp.lt.s32.totalorder %v325_v9, 0  ;;  %vm114_vm15 = vweird.f32 %v325_v9 }
  0x86   :  { %v26_v11 = vshrl.u32 %v25_v10, 23  ;;  %v29_v17 = vand.u32 8388607, %v22_v14  ;;  %vm23_vm8 = vcmp.le.f32.partialorder %v22_v14, 0.7853982 }
  0x88   :  { %v251_v12 = vadd.s32 4294967169, %v26_v11  ;;  %v30_v36 = vor.u32 8388608, %v29_v17 }
  0x8a   :  { %v32_v13 = vadd.s32 1, %v251_v12  ;;  %v70_v50 = vshll.u32 %v30_v36, 8 }
  0x8c   :  { %vm33_vm0 = vcmp.gt.s32.totalorder %v32_v13, 0 }
  0x8d   :  { %v34_v15 = vsel %vm33_vm0, %v32_v13, 0  ;;  %vm233_vm0 = vcmask 130048  }
  0x8e   :  { %v36_v16 = vand.u32 31, %v34_v15  ;;  %v35_v19 = vshrl.u32 %v34_v15, 5 }
  0x90   :  { %v37_v18 = vsub.s32 32, %v36_v16  ;;  %v39_v21 = vshll.u32 %v304_v20, %v36_v16  ;;  %v42_v23 = vshll.u32 %v305_v22, %v36_v16  ;;  %v45_v27 = vshll.u32 %v306_v25, %v36_v16 }
  0x91   :  { %v48_v30 = vshll.u32 %v307_v28, %v36_v16  ;;  %v51_v33 = vshll.u32 %v308_v31, %v36_v16  ;;  %vm54_vm1 = vcmp.lt.s32.totalorder %v35_v19, 1  ;;  %vm57_vm2 = vcmp.lt.s32.totalorder %v35_v19, 4 }
  0x92   :  { %v40_v24 = vshrl.u32 %v305_v22, %v37_v18  ;;  %v43_v26 = vshrl.u32 %v306_v25, %v37_v18  ;;  %v46_v29 = vshrl.u32 %v307_v28, %v37_v18  ;;  %v49_v32 = vshrl.u32 %v308_v31, %v37_v18 }
  0x93   :  { %v52_v35 = vshrl.u32 %v309_v34, %v37_v18  ;;  %v38_v45 = vshrl.u32 %v304_v20, %v37_v18  ;;  %vm56_vm3 = vcmp.lt.s32.totalorder %v35_v19, 3  ;;  %vm55_vm4 = vcmp.lt.s32.totalorder %v35_v19, 2 }
  0x94   :  { %v41_v37 = vor.u32 %v40_v24, %v39_v21  ;;  %v44_v38 = vor.u32 %v43_v26, %v42_v23  ;;  %v47_v39 = vor.u32 %v46_v29, %v45_v27  ;;  %v50_v40 = vor.u32 %v49_v32, %v48_v30 }
  0x95   :  { %v53_v41 = vor.u32 %v52_v35, %v51_v33 }
  0x96   :  { %v59_v42 = vsel %vm57_vm2, %v47_v39, 2102212464  ;;  %v62_v43 = vsel %vm54_vm1, %v41_v37, %v44_v38  ;;  %v66_v44 = vsel %vm54_vm1, %v44_v38, %v47_v39  ;;  %v63_v46 = vsel %vm57_vm2, %v50_v40, 920167782 }
  0x97   :  { %v67_v47 = vsel %vm57_vm2, %v53_v41, 1326507024  ;;  %v64_v48 = vsel %vm56_vm3, %v47_v39, %v63_v46  ;;  %v58_v51 = vsel %vm54_vm1, %v38_v45, %v41_v37  ;;  %v60_v52 = vsel %vm56_vm3, %v44_v38, %v59_v42 }
  0x98   :  { %v68_v49 = vsel %vm56_vm3, %v50_v40, %v67_v47  ;;  %v65_v53 = vsel %vm55_vm4, %v62_v43, %v64_v48  ;;  %v61_v59 = vsel %vm55_vm4, %v58_v51, %v60_v52  ;;  %vm235_vm1 = vcmask 261120  }
  0x99   :  { %v69_v54 = vsel %vm55_vm4, %v66_v44, %v68_v49  ;;  %v334_v57 = vmul.u32.u64.low %v70_v50, %v65_v53  ;;  %v335_v58 = vmul.u32.u64.high %v70_v50, %v65_v53, %v334_v57  ;;  %v77_v61 = vmul.u32 %v70_v50, %v61_v59 }
  0x9a   :  { %v331_v55 = vmul.u32.u64.low %v70_v50, %v69_v54  ;;  %v332_v56 = vmul.u32.u64.high %v70_v50, %v69_v54, %v331_v55 }
  0x9b   :  { %v80_v60 = vadd.s32 1, %v335_v58 }
  0x9c   :  { %vm79_vm5 = vc.u32 %v332_v56, %v334_v57  ;;  %v78_v10 = vadd.s32 %v334_v57, %v332_v56 }
  0x9d   :  { %v81_v62 = vsel %vm79_vm5, %v80_v60, %v335_v58 }
  0x9e   :  { %v82_v63 = vadd.s32 %v81_v62, %v77_v61 }
  0xa0   :  { %v83_v0 = vadd.s32 536870912, %v82_v63 }
  0xa2   :  { %v84_v1 = vshrl.u32 %v83_v0, 30 }
  0xa4   :  { %v85_v2 = vshll.u32 %v84_v1, 30  ;;  %v108_v23 = vsub.s32 4, %v84_v1 }
  0xa6   :  { %v86_v3 = vsub.s32 %v82_v63, %v85_v2  ;;  %v109_v26 = vsel %vm24_vm7, %v108_v23, %v84_v1 }
  0xa7   :  { %v111_v28 = vsel %vm23_vm8, 0, %v109_v26 }
  0xa8   :  { %v88_v4 = vsub.s32 0, %v86_v3  ;;  %v115_v29 = vadd.s32 3, %v111_v28  ;;  %v219_v31 = vand.u32 3, %v111_v28 }
  0xaa   :  { %v252_v5 = vmin.u32 %v88_v4, %v86_v3  ;;  %v116_v30 = vand.u32 3, %v115_v29  ;;  %vm224_vm10 = vcmp.eq.s32.totalorder %v219_v31, 2  ;;  %vm221_vm12 = vcmp.eq.s32.totalorder %v219_v31, 0 }
  0xab   :  { %vm220_vm14 = vcmp.lt.s32.totalorder %v219_v31, 2 }
  0xac   :  { %v90_v6 = vclz %v252_v5  ;;  %vm121_vm9 = vcmp.eq.s32.totalorder %v116_v30, 2  ;;  %vm118_vm11 = vcmp.eq.s32.totalorder %v116_v30, 0  ;;  %vm117_vm13 = vcmp.lt.s32.totalorder %v116_v30, 2 }
  0xae   :  { %v253_v7 = vadd.s32 4294967294, %v90_v6 }
  0xb0   :  { %vm254_vm6 = vcmp.lt.s32.totalorder %v253_v7, 0 }
  0xb1   :  { %v93_v8 = vsel %vm254_vm6, 0, %v253_v7 }
  0xb2   :  { %v94_v11 = vsub.s32 32, %v93_v8  ;;  %v98_v12 = vsub.s32 4294967266, %v93_v8  ;;  %v95_v13 = vshll.u32 %v86_v3, %v93_v8 }
  0xb4   :  { %v96_v15 = vshrl.u32 %v78_v10, %v94_v11  ;;  %v99_v16 = vadd.s32 127, %v98_v12 }
  0xb6   :  { %v97_v17 = vor.u32 %v96_v15, %v95_v13  ;;  %v100_v18 = vshll.u32 %v99_v16, 23 }
  0xb8   :  { %v101_v19 = vor.u32 4788187, %v100_v18  ;;  %v104_v21 = vcvt.s32.f32 %v97_v17 }
  0xba   :  { %v102_v20 = vand.u32 2147483647, %v101_v19 }
  0xbc   :  { %v105_v22 = vmul.f32 %v104_v21, %v102_v20 }
  0xbe   :  { %v106_v24 = vxor.u32 2147483648, %v105_v22 }
  0xc0   :  { %v107_v25 = vsel %vm24_vm7, %v106_v24, %v105_v22 }
  0xc1   :  { %v110_v27 = vsel %vm23_vm8, %v325_v9, %v107_v25 }
  0xc2   :  { %275 = vcosq.f32 %v110_v27 }
  0xc3   :  { %277 = vsinq.f32 %v110_v27 }
  0xcc   :  { %v276_v32 = vpop.eup %275 }
  0xcd   :  { %v278_v33 = vpop.eup %277  ;;  %v122_v34 = vxor.u32 2147483648, %v276_v32 }
  0xce   :  { %v119_v35 = vxor.u32 2147483648, %v278_v33 }
  0xcf   :  { %v226_v36 = vsel %vm224_vm10, %v122_v34, %v278_v33  ;;  %v123_v37 = vsel %vm121_vm9, %v122_v34, %v278_v33 }
  0xd0   :  { %v223_v14 = vsel %vm221_vm12, %v276_v32, %v119_v35  ;;  %v120_v38 = vsel %vm118_vm11, %v276_v32, %v119_v35 }
  0xd1   :  { %v227_v39 = vsel %vm220_vm14, %v223_v14, %v226_v36  ;;  %v124_v40 = vsel %vm117_vm13, %v120_v38, %v123_v37 }
  0xd2   :  { %v228_v41 = vsel %vm114_vm15, nan, %v227_v39  ;;  %v125_v42 = vsel %vm114_vm15, nan, %v124_v40 }
  0xd3   :  { %230 = vrot.lane.b32.xlu0 %v228_v41, %s310_s0 }
 0x145   :  { %v231_v43 = vpop.permute.xlu0 %230 }
 0x146   :  { %v234_v44 = vsel %vm233_vm0, %v125_v42, %v231_v43 }
 0x147   :  { %236 = vst.msk [vmem:[#allocation2] sm:$0xff] %vm235_vm1, %v234_v44 }
 0x148   :  { %290 = shalt.err (!%p287_p4)
}
 0x149   :  { %s291_s13 = scalar_lea.hbm %s359_s1, 128 }
 0x14a   :  { %p292_p5 = scmp.ne.s32.totalorder %s359_s1, %s291_s13  ;;  %p295_p6 = scmp.lt.u32.totalorder %s291_s13, %s359_s1 }
 0x14c   :  { %p297_p7 = pnand %p295_p6, %p292_p5 }
 0x14e   :  { %300 = shalt.err (!%p297_p7)
}
 0x14f   :  { %246 = dma.vmem_to_hbm [thread:$0]  %s244_s9, 128, %s359_s1, [#allocation3]  }
 0x150   :  { %301 = dma.done.wait [#allocation3], 128  }
 0x151   :  { %302 = vsyncadd [#allocation3], 4294967168 }
 0x152   :  { %250 = vsyncpa [#allocation3], 1 }

</bundles_post_ra>
